<compile_context>
chip_gen: v5e
topology: v5e:2x2
jax: 0.10.0
libtpu: 0.0.40
codegen_flags: <defaults>
</compile_context>

<pallas_src>
import functools
from typing import NamedTuple

import jax
import jax.numpy as jnp
from jax.experimental import pallas as pl
from jax.experimental.pallas import tpu as pltpu

_RESIDENT_BUDGET_BYTES = 40 << 20  # conservative vs. v7x's 64 MiB physical VMEM


def _round_up(n, m):
    return (n + m - 1) // m * m


def _pad_dim(d):
    """Lane-dense padding. Prefer 256-multiples for large dims (2x256^2 MXU on
    v6e/v7x) but only when that adds <=12.5% padding over the 128-multiple."""
    p128 = _round_up(d, 128)
    p256 = _round_up(d, 256)
    if d >= 256 and p256 <= p128 * 9 // 8:
        return p256
    return p128


def _pick_tile_m(b):
    """Batch (MXU-M) tile: big tiles amortize per-grid-step overhead and MXU
    weight pushes, but tiny batches are not padded up to the tile size."""
    if b <= 128:
        return max(16, _round_up(b, 16))      # bf16 sublane pack; single tile
    if _round_up(b, 256) == _round_up(b, 128):
        return 256                            # bigger tile at no extra padding
    return 128


@functools.lru_cache(maxsize=None)
def _single_buffer_supported():
    """Probe whether pipeline_mode=pl.Buffered(1) (single-buffered resident
    operands) is supported and correct on this jax version; fall back if not."""
    def k(a_ref, b_ref, o_ref):
        o_ref[...] = a_ref[...] + b_ref[...]

    try:
        a = jnp.arange(16 * 128, dtype=jnp.float32).reshape(16, 128)
        b = jnp.full((8, 128), 2.0, jnp.float32)
        f = pl.pallas_call(
            k,
            out_shape=jax.ShapeDtypeStruct((16, 128), jnp.float32),
            grid=(2,),
            in_specs=[
                pl.BlockSpec((8, 128), lambda i: (i, 0)),
                pl.BlockSpec((8, 128), lambda i: (0, 0),
                             pipeline_mode=pl.Buffered(1)),
            ],
            out_specs=pl.BlockSpec((8, 128), lambda i: (i, 0)),
        )
        y = jax.block_until_ready(jax.jit(f)(a, b))
        return bool(jnp.allclose(y, a + 2.0))
    except Exception:
        return False


# --------------------------------------------------------------------------- #
# Kernels
# --------------------------------------------------------------------------- #
def mlp_resident_kernel(x_ref, w1_ref, b1_ref, w2_ref, b2_ref, o_ref):
    """Fully-resident weights: one grid axis over batch tiles."""
    h = jnp.dot(x_ref[...], w1_ref[...], preferred_element_type=jnp.float32)
    h = jnp.maximum(h + b1_ref[...], 0.0)           # bias + ReLU in f32
    out = jnp.dot(h.astype(w2_ref.dtype), w2_ref[...],
                  preferred_element_type=jnp.float32)
    o_ref[...] = (out + b2_ref[...]).astype(o_ref.dtype)


def mlp_hid_tiled_kernel(x_ref, w1_ref, b1_ref, w2_ref, b2_ref, o_ref, acc_ref):
    """Large-layer fallback: grid (batch_tiles, hid_tiles); hid axis reduces
    into an f32 VMEM accumulator (init at h==0, finalize at last h)."""
    h_idx = pl.program_id(1)

    @pl.when(h_idx == 0)
    def _():
        acc_ref[...] = jnp.zeros_like(acc_ref)

    h = jnp.dot(x_ref[...], w1_ref[...], preferred_element_type=jnp.float32)
    h = jnp.maximum(h + b1_ref[...], 0.0)
    acc_ref[...] += jnp.dot(h.astype(w2_ref.dtype), w2_ref[...],
                            preferred_element_type=jnp.float32)

    @pl.when(h_idx == pl.num_programs(1) - 1)
    def _():
        o_ref[...] = (acc_ref[...] + b2_ref[...]).astype(o_ref.dtype)


# --------------------------------------------------------------------------- #
# Parameter preparation (one-time pad + cast, kept on device)
# --------------------------------------------------------------------------- #
class MLPParams(NamedTuple):
    w1p: jax.Array
    b1p: jax.Array
    w2p: jax.Array
    b2p: jax.Array
    in_f: int
    hid: int
    nc: int


def prepare_params(w1, b1, w2, b2, mxu_dtype=jnp.bfloat16):
    """Pad feature dims to lane-dense multiples and cast weights to the MXU
    dtype ONCE (not per forward call). Biases stay f32 (added post-matmul)."""
    in_f, hid = w1.shape
    nc = w2.shape[1]
    in_p, hid_p, nc_p = _pad_dim(in_f), _pad_dim(hid), _pad_dim(nc)

    w1p = jnp.zeros((in_p, hid_p), mxu_dtype).at[:in_f, :hid].set(
        w1.astype(mxu_dtype))
    w2p = jnp.zeros((hid_p, nc_p), mxu_dtype).at[:hid, :nc].set(
        w2.astype(mxu_dtype))
    b1p = jnp.zeros((1, hid_p), jnp.float32).at[:, :hid].set(
        b1.astype(jnp.float32).reshape(1, hid))
    b2p = jnp.zeros((1, nc_p), jnp.float32).at[:, :nc].set(
        b2.astype(jnp.float32).reshape(1, nc))
    return MLPParams(w1p, b1p, w2p, b2p, in_f, hid, nc)


# --------------------------------------------------------------------------- #
# Forward
# --------------------------------------------------------------------------- #
@functools.partial(
    jax.jit,
    static_argnames=("nc", "single_buf", "force_hid_tiled",
                     "tile_h_override", "tile_m_override"))
def _mlp_forward_impl(x, w1p, b1p, w2p, b2p, *, nc, single_buf,
                      force_hid_tiled=False, tile_h_override=None,
                      tile_m_override=None):
    B, in_f = x.shape
    in_p, hid_p = w1p.shape
    nc_p = w2p.shape[1]
    mxu_dtype = w1p.dtype
    out_dtype = x.dtype
    itm = mxu_dtype.itemsize
    oitm = out_dtype.itemsize

    tile_m = tile_m_override if tile_m_override is not None else _pick_tile_m(B)
    b_p = _round_up(B, tile_m)
    n_bt = b_p // tile_m

    # Pad + cast x inside the jit (fuses with surrounding ops; zero rows/cols
    # are inert for the matmuls and sliced off at the end).
    xp = jnp.zeros((b_p, in_p), mxu_dtype).at[:B, :in_f].set(x.astype(mxu_dtype))

    wbuf = 1 if single_buf else 2

    def const_spec(shape):
        # Constant index_map -> DMA'd once; single-buffer when supported.
        if single_buf:
            return pl.BlockSpec(shape, lambda *_: (0,) * len(shape),
                                pipeline_mode=pl.Buffered(1))
        return pl.BlockSpec(shape, lambda *_: (0,) * len(shape))

    flops = 2 * b_p * (in_p * hid_p + hid_p * nc_p)

    # VMEM budget if all weights stay resident.
    resident_bytes = (
        (in_p * hid_p + hid_p * nc_p) * itm * wbuf     # w1, w2
        + (hid_p + nc_p) * 4 * wbuf                    # b1, b2 (f32)
        + tile_m * in_p * itm * 2                      # x tile, double-buffered
        + tile_m * nc_p * oitm * 2                     # out tile, double-buffered
        + tile_m * hid_p * (4 + itm)                   # h intermediate (+cast)
        + tile_m * nc_p * 4                            # fc2 f32 accumulator
    )

    use_resident = (resident_bytes <= _RESIDENT_BUDGET_BYTES
                    and not force_hid_tiled)

    if use_resident:
        vmem_limit = max(int(resident_bytes * 1.4) + (4 << 20), 16 << 20)
        bytes_accessed = (xp.size * itm + w1p.size * itm + w2p.size * itm
                          + b1p.size * 4 + b2p.size * 4 + b_p * nc_p * oitm)
        out_p = pl.pallas_call(
            mlp_resident_kernel,
            out_shape=jax.ShapeDtypeStruct((b_p, nc_p), out_dtype),
            grid_spec=pltpu.PrefetchScalarGridSpec(
                num_scalar_prefetch=0,
                grid=(n_bt,),
                in_specs=[
                    pl.BlockSpec((tile_m, in_p), lambda i: (i, 0)),
                    const_spec((in_p, hid_p)),
                    const_spec((1, hid_p)),
                    const_spec((hid_p, nc_p)),
                    const_spec((1, nc_p)),
                ],
                out_specs=pl.BlockSpec((tile_m, nc_p), lambda i: (i, 0)),
            ),
            compiler_params=pltpu.CompilerParams(
                dimension_semantics=("parallel",),
                vmem_limit_bytes=vmem_limit),
            cost_estimate=pl.CostEstimate(
                flops=flops, transcendentals=0, bytes_accessed=bytes_accessed),
        )(xp, w1p, b1p, w2p, b2p)
    else:
        # Hidden-dim tiled fallback (keeps the fused single-pass structure while
        # bounding VMEM to a few tiles — required for big layers on v7x).
        def tiled_bytes(th):
            return (tile_m * in_p * itm * 2            # x tile
                    + in_p * th * itm * 2              # w1 tile (streamed)
                    + th * 4 * 2                       # b1 tile
                    + th * nc_p * itm * 2              # w2 tile (streamed)
                    + nc_p * 4 * wbuf                  # b2 (resident)
                    + tile_m * nc_p * oitm * 2         # out tile
                    + tile_m * nc_p * 4                # acc scratch
                    + tile_m * th * (4 + itm))         # h intermediate (+cast)

        candidates = [t for t in (512, 256, 128) if hid_p % t == 0]
        if tile_h_override is not None:
            tile_h = tile_h_override
        else:
            tile_h = next((t for t in candidates
                           if tiled_bytes(t) <= _RESIDENT_BUDGET_BYTES),
                          candidates[-1])
        n_h = hid_p // tile_h
        vmem_limit = max(int(tiled_bytes(tile_h) * 1.4) + (4 << 20), 16 << 20)
        bytes_accessed = (xp.size * itm
                          + (w1p.size + w2p.size) * itm * n_bt
                          + b1p.size * 4 * n_bt + b2p.size * 4
                          + b_p * nc_p * oitm)
        out_p = pl.pallas_call(
            mlp_hid_tiled_kernel,
            out_shape=jax.ShapeDtypeStruct((b_p, nc_p), out_dtype),
            grid_spec=pltpu.PrefetchScalarGridSpec(
                num_scalar_prefetch=0,
                grid=(n_bt, n_h),
                in_specs=[
                    pl.BlockSpec((tile_m, in_p), lambda i, h: (i, 0)),
                    pl.BlockSpec((in_p, tile_h), lambda i, h: (0, h)),
                    pl.BlockSpec((1, tile_h), lambda i, h: (0, h)),
                    pl.BlockSpec((tile_h, nc_p), lambda i, h: (h, 0)),
                    const_spec((1, nc_p)),
                ],
                out_specs=pl.BlockSpec((tile_m, nc_p), lambda i, h: (i, 0)),
                scratch_shapes=[pltpu.VMEM((tile_m, nc_p), jnp.float32)],
            ),
            compiler_params=pltpu.CompilerParams(
                dimension_semantics=("parallel", "arbitrary"),
                vmem_limit_bytes=vmem_limit),
            cost_estimate=pl.CostEstimate(
                flops=flops, transcendentals=0, bytes_accessed=bytes_accessed),
        )(xp, w1p, b1p, w2p, b2p)

    # Slice the logical result out of the padded slab (fused inside the jit).
    return out_p[:B, :nc]


def mlp_forward(x, params: MLPParams, *, force_hid_tiled=False, tile_h=None,
                tile_m=None):
    """Forward pass of Net:  fc2(relu(fc1(x))).  x: (B, input_size)."""
    single_buf = _single_buffer_supported()
    return _mlp_forward_impl(
        x, params.w1p, params.b1p, params.w2p, params.b2p,
        nc=params.nc, single_buf=single_buf,
        force_hid_tiled=force_hid_tiled, tile_h_override=tile_h,
        tile_m_override=tile_m)


def init_params(key, input_size, hidden_size, num_classes, dtype=jnp.float32):
    """Deterministic init mimicking nn.Linear's default U(-1/sqrt(fan_in), +)."""
    k1, k2, k3, k4 = jax.random.split(key, 4)
    bound1 = 1.0 / (input_size ** 0.5)
    bound2 = 1.0 / (hidden_size ** 0.5)
    # Stored as (in, out) = transpose of PyTorch's (out, in) weight layout.
    w1 = jax.random.uniform(k1, (input_size, hidden_size), dtype,
                            minval=-bound1, maxval=bound1)
    b1 = jax.random.uniform(k2, (1, hidden_size), dtype,
                            minval=-bound1, maxval=bound1)
    w2 = jax.random.uniform(k3, (hidden_size, num_classes), dtype,
                            minval=-bound2, maxval=bound2)
    b2 = jax.random.uniform(k4, (1, num_classes), dtype,
                            minval=-bound2, maxval=bound2)
    return w1, b1, w2, b2


if __name__ == "__main__":
    batch = 8
    input_size = 32
    hidden_size = 64
    num_classes = 16

    key = jax.random.PRNGKey(0)
    kx, kp = jax.random.split(key)
    x = jax.random.normal(kx, (batch, input_size), jnp.float32)
    w1, b1, w2, b2 = init_params(kp, input_size, hidden_size, num_classes)
    params = prepare_params(w1, b1, w2, b2)

    # --- Test 1: small layer -> resident-weights path -----------------------
    out = jax.block_until_ready(mlp_forward(x, params))
    assert out.shape == (batch, num_classes)

    bf = jnp.bfloat16
    h_ref = jnp.maximum(
        jnp.dot(x.astype(bf), w1.astype(bf),
                preferred_element_type=jnp.float32) + b1, 0.0)
    ref_bf16 = jnp.dot(h_ref.astype(bf), w2.astype(bf),
                       preferred_element_type=jnp.float32) + b2
    assert jnp.allclose(out, ref_bf16, atol=1e-2, rtol=1e-2)

    ref_f32 = jnp.maximum(x @ w1 + b1, 0.0) @ w2 + b2
    assert jnp.allclose(out, ref_f32, atol=5e-2, rtol=5e-2)

    # --- Test 2: force the hidden-tiled (large-layer / v7x) path -------------
    hidden2 = 256
    kx2, kp2 = jax.random.split(jax.random.PRNGKey(1))
    x2 = jax.random.normal(kx2, (batch, input_size), jnp.float32)
    w1b, b1b, w2b, b2b = init_params(kp2, input_size, hidden2, num_classes)
    params2 = prepare_params(w1b, b1b, w2b, b2b)
    out2 = jax.block_until_ready(
        mlp_forward(x2, params2, force_hid_tiled=True, tile_h=128))
    ref2 = jnp.maximum(x2 @ w1b + b1b, 0.0) @ w2b + b2b
    assert out2.shape == (batch, num_classes)
    assert jnp.allclose(out2, ref2, atol=5e-2, rtol=5e-2)

    print("KERNEL_OK")
</pallas_src>

<mosaic_0001>
module attributes {stable_mosaic.version = 11 : i64} {
  func.func @k(%arg0: i32, %arg1: memref<8x128xf32, #tpu.memory_space<vmem>>, %arg2: memref<8x128xf32, #tpu.memory_space<vmem>>, %arg3: memref<8x128xf32, #tpu.memory_space<vmem>>) attributes {dimension_semantics = [#tpu.dimension_semantics<arbitrary>], iteration_bounds = array<i64: 2>, scalar_prefetch = 0 : i64, scratch_operands = 0 : i64, tpu.core_type = #tpu.core_type<tc>, window_params = [{transform_indices = @transform_0, window_bounds = array<i64: 8, 128>}, {pipeline_mode = #tpu.pipeline_mode<synchronous>, transform_indices = @transform_1, window_bounds = array<i64: 8, 128>}, {transform_indices = @transform_2, window_bounds = array<i64: 8, 128>}]} {
    %c0 = arith.constant 0 : index
    %c0_0 = arith.constant 0 : index
    %0 = vector.load %arg1[%c0, %c0_0] : memref<8x128xf32, #tpu.memory_space<vmem>>, vector<8x128xf32>
    %c0_1 = arith.constant 0 : index
    %c0_2 = arith.constant 0 : index
    %1 = vector.load %arg2[%c0_1, %c0_2] : memref<8x128xf32, #tpu.memory_space<vmem>>, vector<8x128xf32>
    %2 = arith.addf %0, %1 : vector<8x128xf32>
    %c0_3 = arith.constant 0 : index
    %c0_4 = arith.constant 0 : index
    %3 = vector.load %arg3[%c0_3, %c0_4] : memref<8x128xf32, #tpu.memory_space<vmem>>, vector<8x128xf32>
    tpu.vector_store %arg3[%c0_3, %c0_4], %2 {strides = array<i32>} : memref<8x128xf32, #tpu.memory_space<vmem>>, vector<8x128xf32>,
    return
  }
  func.func @transform_0(%arg0: i32) -> (i32, i32) {
    %c0_i32 = arith.constant 0 : i32
    %c0_i32_0 = arith.constant 0 : i32
    return %arg0, %c0_i32 : i32, i32
  }
  func.func @transform_1(%arg0: i32) -> (i32, i32) {
    %c0_i32 = arith.constant 0 : i32
    %c0_i32_0 = arith.constant 0 : i32
    %c0_i32_1 = arith.constant 0 : i32
    return %c0_i32, %c0_i32_0 : i32, i32
  }
  func.func @transform_2(%arg0: i32) -> (i32, i32) {
    %c0_i32 = arith.constant 0 : i32
    %c0_i32_0 = arith.constant 0 : i32
    return %arg0, %c0_i32 : i32, i32
  }
}

module attributes {stable_mosaic.version = 11 : i64} {
  func.func @mlp_resident_kernel(%arg0: i32, %arg1: memref<16x128xbf16, #tpu.memory_space<vmem>>, %arg2: memref<128x128xbf16, #tpu.memory_space<vmem>>, %arg3: memref<1x128xf32, #tpu.memory_space<vmem>>, %arg4: memref<128x128xbf16, #tpu.memory_space<vmem>>, %arg5: memref<1x128xf32, #tpu.memory_space<vmem>>, %arg6: memref<16x128xf32, #tpu.memory_space<vmem>>) attributes {dimension_semantics = [#tpu.dimension_semantics<parallel>], iteration_bounds = array<i64: 1>, scalar_prefetch = 0 : i64, scratch_operands = 0 : i64, tpu.core_type = #tpu.core_type<tc>, window_params = [{transform_indices = @transform_0, window_bounds = array<i64: 16, 128>}, {pipeline_mode = #tpu.pipeline_mode<synchronous>, transform_indices = @transform_1, window_bounds = array<i64: 128, 128>}, {pipeline_mode = #tpu.pipeline_mode<synchronous>, transform_indices = @transform_2, window_bounds = array<i64: 1, 128>}, {pipeline_mode = #tpu.pipeline_mode<synchronous>, transform_indices = @transform_3, window_bounds = array<i64: 128, 128>}, {pipeline_mode = #tpu.pipeline_mode<synchronous>, transform_indices = @transform_4, window_bounds = array<i64: 1, 128>}, {transform_indices = @transform_5, window_bounds = array<i64: 16, 128>}]} {
    %c0 = arith.constant 0 : index
    %c0_0 = arith.constant 0 : index
    %0 = vector.load %arg1[%c0, %c0_0] : memref<16x128xbf16, #tpu.memory_space<vmem>>, vector<16x128xbf16>
    %c0_1 = arith.constant 0 : index
    %c0_2 = arith.constant 0 : index
    %1 = vector.load %arg2[%c0_1, %c0_2] : memref<128x128xbf16, #tpu.memory_space<vmem>>, vector<128x128xbf16>
    %cst = arith.constant dense<0.000000e+00> : vector<16x128xf32>
    %2 = tpu.matmul %0, %1, %cst {dimension_numbers = #tpu.dot_dimension_numbers<[1], [0], [0], [1], [0, 0, 1, 1], [], []>} : vector<16x128xbf16>, vector<128x128xbf16>, vector<16x128xf32> -> vector<16x128xf32>
    %c0_3 = arith.constant 0 : index
    %c0_4 = arith.constant 0 : index
    %3 = vector.load %arg3[%c0_3, %c0_4] : memref<1x128xf32, #tpu.memory_space<vmem>>, vector<1x128xf32>
    %4 = vector.broadcast %3 : vector<1x128xf32> to vector<16x128xf32>
    %5 = arith.addf %2, %4 : vector<16x128xf32>
    %cst_5 = arith.constant 0.000000e+00 : f32
    %6 = vector.broadcast %cst_5 : f32 to vector<16x128xf32>
    %7 = arith.maximumf %5, %6 : vector<16x128xf32>
    %8 = arith.truncf %7 : vector<16x128xf32> to vector<16x128xbf16>
    %c0_6 = arith.constant 0 : index
    %c0_7 = arith.constant 0 : index
    %9 = vector.load %arg4[%c0_6, %c0_7] : memref<128x128xbf16, #tpu.memory_space<vmem>>, vector<128x128xbf16>
    %cst_8 = arith.constant dense<0.000000e+00> : vector<16x128xf32>
    %10 = tpu.matmul %8, %9, %cst_8 {dimension_numbers = #tpu.dot_dimension_numbers<[1], [0], [0], [1], [0, 0, 1, 1], [], []>} : vector<16x128xbf16>, vector<128x128xbf16>, vector<16x128xf32> -> vector<16x128xf32>
    %c0_9 = arith.constant 0 : index
    %c0_10 = arith.constant 0 : index
    %11 = vector.load %arg5[%c0_9, %c0_10] : memref<1x128xf32, #tpu.memory_space<vmem>>, vector<1x128xf32>
    %12 = vector.broadcast %11 : vector<1x128xf32> to vector<16x128xf32>
    %13 = arith.addf %10, %12 : vector<16x128xf32>
    %c0_11 = arith.constant 0 : index
    %c0_12 = arith.constant 0 : index
    %14 = vector.load %arg6[%c0_11, %c0_12] : memref<16x128xf32, #tpu.memory_space<vmem>>, vector<16x128xf32>
    tpu.vector_store %arg6[%c0_11, %c0_12], %13 {strides = array<i32>} : memref<16x128xf32, #tpu.memory_space<vmem>>, vector<16x128xf32>,
    return
  }
  func.func @transform_0(%arg0: i32) -> (i32, i32) {
    %c0_i32 = arith.constant 0 : i32
    %c0_i32_0 = arith.constant 0 : i32
    return %arg0, %c0_i32 : i32, i32
  }
  func.func @transform_1(%arg0: i32) -> (i32, i32) {
    %c0_i32 = arith.constant 0 : i32
    %c0_i32_0 = arith.constant 0 : i32
    %c0_i32_1 = arith.constant 0 : i32
    return %c0_i32, %c0_i32_0 : i32, i32
  }
  func.func @transform_2(%arg0: i32) -> (i32, i32) {
    %c0_i32 = arith.constant 0 : i32
    %c0_i32_0 = arith.constant 0 : i32
    %c0_i32_1 = arith.constant 0 : i32
    return %c0_i32, %c0_i32_0 : i32, i32
  }
  func.func @transform_3(%arg0: i32) -> (i32, i32) {
    %c0_i32 = arith.constant 0 : i32
    %c0_i32_0 = arith.constant 0 : i32
    %c0_i32_1 = arith.constant 0 : i32
    return %c0_i32, %c0_i32_0 : i32, i32
  }
  func.func @transform_4(%arg0: i32) -> (i32, i32) {
    %c0_i32 = arith.constant 0 : i32
    %c0_i32_0 = arith.constant 0 : i32
    %c0_i32_1 = arith.constant 0 : i32
    return %c0_i32, %c0_i32_0 : i32, i32
  }
  func.func @transform_5(%arg0: i32) -> (i32, i32) {
    %c0_i32 = arith.constant 0 : i32
    %c0_i32_0 = arith.constant 0 : i32
    return %arg0, %c0_i32 : i32, i32
  }
}

</mosaic_0001>

<bundles_post_ra>
// kernel: tpu_custom_call.1
= control target key start
LH: loop header
LB: loop body
LE: loop exit
PB: predicated region body
PF: predicated region fallthrough
CT: control target
= control target key end

     0   :  { %7 = vsyncpa [#allocation3], 0  ;;  %s633_s0 = inlined_call_operand.hbm [shape: f32[16,128], index: 0, kind: input, shape index: {}]   ;;  %s634_s1 = inlined_call_operand.hbm [shape: f32[8,128], index: 1, kind: input, shape index: {}]   ;;  %s635_s2 = inlined_call_operand.hbm [shape: f32[16,128], index: 2, kind: output, shape index: {}]  }
   0x1   :  { %9 = vsyncpa [#allocation3 + $0x1], 0 }
   0x2   :  { %10 = vsyncpa [#allocation6], 0 }
   0x3   :  { %11 = vsyncpa [#allocation4], 0 }
   0x4   :  { %13 = vsyncpa [#allocation4 + $0x1], 0  ;;  %s495_s9 = smov 0   ;;  %s497_s10 = smov 0  }
   0x5   :  { %s499_s11 = smov 0   ;;  %s501_s12 = smov 0  }
   0x6 LB: > { %s516_s13 = sadd.s32 4294967295, %s477_s12   ;;  %s276_s14 = sadd.s32 4294967294, %s477_s12   ;;  %s477_s12 = sphi %s501_s12, %s645_s12   ;;  %s473_s11 = sphi %s499_s11, %s644_s11   ;;  %s469_s10 = sphi %s497_s10, %s643_s10   ;;  %s465_s9 = sphi %s495_s9, %s642_s9  }
   0x7   : > { %p39_p0 = scmp.ne.s32.totalorder %s469_s10, %s465_s9  ;;  %p40_p1 = scmp.eq.s32.totalorder %s516_s13, 0 }
   0x8   : > { %p84_p2 = scmp.eq.s32.totalorder %s516_s13, 1  ;;  %p90_p3 = scmp.eq.s32.totalorder %s276_s14, 1 }
   0x9   : > { %p525_p4 = por %p40_p1, %p39_p0  ;;  %p277_p5 = scmp.ge.s32.totalorder %s477_s12, 1 }
   0xa   : > { %p530_p6 = por %p90_p3, %p39_p0  ;;  %p97_p7 = scmp.lt.s32.totalorder %s477_s12, 3 }
   0xb   : > { %s109_s19 = sshll.u32 %s634_s1, 4  ;;  %s479_s21 = smov [#allocation5]   ;;  %s110_s19 = int_to_ptr.hbm [resolvable:$true] %s109_s19 }
   0xc   : > { %p538_p8 = pnand %p277_p5, %p97_p7  ;;  %s111_s22 = sshll.u32 %s479_s21, 4  ;;  %s112_s22 = int_to_ptr.vmem [resolvable:$true] %s111_s22 }
   0xd   : > { %s548_s23 = sadd.s32 1, %s477_s12   ;;  %s26_s24 = sadd.s32 1, %s473_s11 }
   0xe   : > { %p298_p10 = pneg %p538_p8  ;;  %s23_s25 = ssub.s32 %s477_s12, %s548_s23 }
   0xf   : > { %p24_p12 = scmp.eq.s32.totalorder %s23_s25, 0  ;;  %p33_p13 = scmp.ne.s32.totalorder %s473_s11, %s469_s10 }
  0x10   : > { %p299_p11 = pnand %p298_p10, %p40_p1  ;;  %p34_p0 = scmp.eq.s32.totalorder %s477_s12, 0 }
  0x11   : > { %s557_s26 = scalar_select %p24_p12, %s473_s11, %s26_s24  }
  0x12   : > { %301 = dma.hbm_to_vmem [thread:$0]  (!%p299_p11), %s110_s19, 128, %s112_s22, [#allocation6]  }
  0x13   : > { %p561_p3 = por %p84_p2, %p33_p13  ;;  %p311_p5 = scmp.lt.s32.totalorder %s477_s12, 2 }
  0x14   : > { %s122_s28 = sand.u32 1, %s473_s11   ;;  %s281_s29 = sshll.u32 %s477_s12, 3 }
  0x15   : > { %p35_p7 = por %p34_p0, %p33_p13  ;;  %s280_s30 = sshll.u32 %s122_s28, 3 }
  0x16   : > { %s130_s5 = scalar_lea.hbm %s633_s0, %s281_s29  ;;  %s126_s7 = scalar_lea.vmem [#allocation2], %s280_s30 }
  0x17   : > { %s132_s6 = sshll.u32 %s130_s5, 4  ;;  %s134_s8 = sshll.u32 %s126_s7, 4  ;;  %s133_s6 = int_to_ptr.hbm [resolvable:$true] %s132_s6  ;;  %s135_s8 = int_to_ptr.vmem [resolvable:$true] %s134_s8 }
  0x18   : > { %p571_p10 = pnand %p311_p5, %p35_p7  ;;  %s123_s17 = scalar_lea.sflag [#allocation3], %s122_s28 }
  0x19   : > { %s377_s18 = sshra.s32 %s133_s6, 4  ;;  %s384_s24 = scalar_lea.hbm %s633_s0, 16  ;;  %s378_s18 = int_to_ptr.hbm [resolvable:$true] %s377_s18 }
  0x1a   : > { %s379_s19 = scalar_lea.hbm %s378_s18, 8  ;;  %p381_p11 = pneg %p571_p10 }
  0x1b   : > { %p380_p2 = scmp.ne.s32.totalorder %s378_s18, %s379_s19  ;;  %p385_p0 = scmp.lt.s32.totalorder %s378_s18, %s633_s0 }
  0x1c   : > { %p386_p5 = scmp.lt.s32.totalorder %s384_s24, %s379_s19 }
  0x1d   : > { %p382_p12 = pnand %p381_p11, %p380_p2 }
  0x1e   : > { %p387_p7 = por %p386_p5, %p385_p0 }
  0x1f   : > { %p383_p13 = pneg %p382_p12 }
  0x21   : > { %p388_p9 = pnand %p387_p7, %p383_p13 }
  0x23   : > { %391 = shalt.err (!%p388_p9)
}
  0x24   : > { %305 = dma.hbm_to_vmem [thread:$0]  (!%p571_p10), %s133_s6, 128, %s135_s8, %s123_s17  }
  0x25   : > { %143 = sbr.rel (%p538_p8) target bundleno = 60 (0x3c), region = 28  ;;  %s588_s28 = sand.u32 (!%p538_p8), 1, %s469_s10  }
  0x26   : > { %s283_s30 = sshll.u32 (!%p538_p8), %s588_s28, 3  ;;  %s146_s3 = scalar_lea.sflag (!%p538_p8), [#allocation3], %s588_s28 }
  0x27   : > { %s149_s4 = scalar_lea.vmem (!%p538_p8), [#allocation2], %s283_s30 }
  0x2a   : > { %452 = dma.done.wait (%p525_p4), %s146_s3, 128  }
  0x2b   : > { %454 = vsyncadd (%p525_p4), %s146_s3, 4294967168 }
  0x2c   : > { %456 = dma.done.wait (%p40_p1), [#allocation6], 128  }
  0x2d   : > { %458 = vsyncadd (%p40_p1), [#allocation6], 4294967168  ;;  %s287_s20 = sshll.u32 %s516_s13, 3  ;;  %s175_s8 = scalar_lea.vmem [#allocation7], %s283_s30  ;;  %v176_v0 = vld [vmem:[%s149_s4] sm:$0xff]  ;;  %v177_v1 = vld [vmem:[#allocation5] sm:$0xff] }
  0x2e   : > { %s191_s7 = scalar_lea.hbm %s635_s2, %s287_s20  ;;  %s193_s14 = sshll.u32 %s175_s8, 4  ;;  %v178_v2 = vadd.f32 %v177_v1, %v176_v0  ;;  %s194_s14 = int_to_ptr.vmem [resolvable:$true] %s193_s14 }
  0x2f   : > { %s195_s17 = sshll.u32 %s191_s7, 4  ;;  %s181_s15 = scalar_lea.sflag [#allocation4], %s588_s28  ;;  %s196_s17 = int_to_ptr.hbm [resolvable:$true] %s195_s17 }
  0x30   : > { %179 = vst [vmem:[%s175_s8] sm:$0xff] %v178_v2  ;;  %s421_s18 = sshra.s32 %s196_s17, 4  ;;  %s427_s22 = scalar_lea.hbm %s635_s2, 16  ;;  %s422_s18 = int_to_ptr.hbm [resolvable:$true] %s421_s18 }
  0x31   : > { %s423_s19 = scalar_lea.hbm %s422_s18, 8  ;;  %p428_p9 = scmp.lt.s32.totalorder %s422_s18, %s635_s2 }
  0x32   : > { %p424_p1 = scmp.ne.s32.totalorder %s422_s18, %s423_s19  ;;  %p429_p10 = scmp.lt.s32.totalorder %s427_s22, %s423_s19 }
  0x34   : > { %p425_p4 = pnand %p424_p1, %p561_p3  ;;  %p430_p2 = por %p429_p10, %p428_p9 }
  0x36   : > { %p426_p8 = pneg %p425_p4 }
  0x38   : > { %p431_p11 = pnand %p430_p2, %p426_p8 }
  0x3a   : > { %434 = shalt.err (!%p431_p11)
}
  0x3b   : > { %296 = dma.vmem_to_hbm [thread:$0]  (%p561_p3), %s194_s14, 128, %s196_s17, %s181_s15  }
  0x3c PF: > { %s207_s29 = sand.u32 1, %s465_s9   ;;  %p641_p12 = scmp.ge.s32.totalorder %s477_s12, 2 }
  0x3d   : > { %s208_s28 = scalar_lea.sflag [#allocation4], %s207_s29 }
  0x3e   : > { %p307_p13 = pnand %p641_p12, %p530_p6 }
  0x40   : > { %p308_p0 = pneg %p307_p13 }
  0x42   : > { %460 = dma.done.wait (%p308_p0), %s208_s28, 128  }
  0x43   : > { %462 = vsyncadd (%p308_p0), %s208_s28, 4294967168  ;;  %p16_p5 = scmp.ge.s32.totalorder %s548_s23, 4   ;;  %s642_s9 = smov %s469_s10 }
  0x44   : > { %s643_s10 = smov %s473_s11  ;;  %s644_s11 = smov %s557_s26 }
  0x45   : > { %s645_s12 = smov %s548_s23  ;;  %18 = sbr.rel (!%p16_p5) target bundleno = 6 (0x6), region = 77 }
  0x4a   :  { %214 = vsyncpa [#allocation3], 1 }
  0x4b   :  { %216 = vsyncpa [#allocation3 + $0x1], 1 }
  0x4c   :  { %217 = vsyncpa [#allocation6], 1 }
  0x4d   :  { %218 = vsyncpa [#allocation4], 1 }
  0x4e   :  { %220 = vsyncpa [#allocation4 + $0x1], 1 }

// kernel: _mlp_forward_impl.1
= control target key start
LH: loop header
LB: loop body
LE: loop exit
PB: predicated region body
PF: predicated region fallthrough
CT: control target
= control target key end

     0   :  { %10 = vsyncpa [#allocation3], 0  ;;  %s433_s0 = inlined_call_operand.vmem [shape: bf16[16,128], index: 0, kind: input, shape index: {}]   ;;  %s434_s1 = inlined_call_operand.hbm [shape: bf16[128,128], index: 1, kind: input, shape index: {}]   ;;  %s435_s2 = inlined_call_operand.vmem [shape: f32[1,128], index: 2, kind: input, shape index: {}]   ;;  %s436_s3 = inlined_call_operand.hbm [shape: bf16[128,128], index: 3, kind: input, shape index: {}]   ;;  %s437_s4 = inlined_call_operand.vmem [shape: f32[1,128], index: 4, kind: input, shape index: {}]   ;;  %s438_s5 = inlined_call_operand.vmem [shape: f32[16,128], index: 5, kind: output, shape index: {}]  }
   0x1   :  { %s18_s20 = sshll.u32 %s434_s1, 4  ;;  %s19_s20 = int_to_ptr.hbm [resolvable:$true] %s18_s20 }
   0x2   :  { %11 = vsyncpa [#allocation5], 0  ;;  %s378_s21 = smov [#allocation2]   ;;  %s33_s25 = sshll.u32 %s436_s3, 4  ;;  %s34_s25 = int_to_ptr.hbm [resolvable:$true] %s33_s25 }
   0x3   :  { %s20_s22 = sshll.u32 %s378_s21, 4  ;;  %s379_s26 = smov 64   ;;  %s21_s22 = int_to_ptr.vmem [resolvable:$true] %s20_s22 }
   0x4   :  { %s380_s27 = smov 4   ;;  %s381_s28 = smov [#allocation4]  }
   0x5   :  { %26 = dma.hbm_to_vmem [thread:$0]  %s19_s20, 1024, %s21_s22, [#allocation3], %s379_s26, %s379_s26, %s380_s27  }
   0x6   :  { %s35_s29 = sshll.u32 %s381_s28, 4  ;;  %s36_s29 = int_to_ptr.vmem [resolvable:$true] %s35_s29 }
   0x7   :  { %41 = dma.hbm_to_vmem [thread:$0]  %s34_s25, 1024, %s36_s29, [#allocation5], %s379_s26, %s379_s26, %s380_s27  }
   0x8   :  { %374 = dma.done.wait [#allocation3], 1024  }
   0x9   :  { %375 = vsyncadd [#allocation3], 4294966272 }
   0xa   :  { %376 = dma.done.wait [#allocation5], 1024  }
   0xb   :  { %377 = vsyncadd [#allocation5], 4294966272  ;;  %v311_v0 = vld [vmem:[#allocation2 + $0x38] sm:$0xff]  ;;  %v310_v1 = vld [vmem:[#allocation2 + $0x30] sm:$0xff] }
   0xc   :  { %128 = vmatpush.bf16.msra.mxu0 %v311_v0  ;;  %v319_v2 = vld [vmem:[#allocation4 + $0x38] sm:$0xff]  ;;  %v318_v3 = vld [vmem:[#allocation4 + $0x30] sm:$0xff]  ;;  %v309_v4 = vld [vmem:[#allocation2 + $0x28] sm:$0xff] }
   0xd   :  { %213 = vmatpush.bf16.msra.mxu1 %v319_v2  ;;  %v317_v5 = vld [vmem:[#allocation4 + $0x28] sm:$0xff]  ;;  %v308_v6 = vld [vmem:[#allocation2 + $0x20] sm:$0xff]  ;;  %v307_v8 = vld [vmem:[#allocation2 + $0x18] sm:$0xff] }
   0xe   :  { %v316_v7 = vld [vmem:[#allocation4 + $0x20] sm:$0xff]  ;;  %v306_v9 = vld [vmem:[#allocation2 + $0x10] sm:$0xff]  ;;  %v305_v10 = vld [vmem:[#allocation2 + $0x8] sm:$0xff] }
   0xf   :  { %v304_v11 = vld [vmem:[#allocation2] sm:$0xff]  ;;  %v315_v13 = vld [vmem:[#allocation4 + $0x18] sm:$0xff]  ;;  %v314_v14 = vld [vmem:[#allocation4 + $0x10] sm:$0xff] }
  0x10   :  { %129 = vmatpush.bf16.msra.mxu0 %v310_v1  ;;  %v303_v12 = vld [vmem:[%s433_s0] sm:$0xff]  ;;  %v313_v15 = vld [vmem:[#allocation4 + $0x8] sm:$0xff] }
  0x11   :  { %214 = vmatpush.bf16.msra.mxu1 %v318_v3  ;;  %v312_v16 = vld [vmem:[#allocation4] sm:$0xff] }
  0x12   :  { %v324_v18 = vld [vmem:[%s435_s2] ss:$0 sm:$0xff] }
  0x13   :  { %v325_v25 = vld [vmem:[%s437_s4] ss:$0 sm:$0xff] }
  0x14   :  { %130 = vmatpush.bf16.msra.mxu0 %v309_v4 }
  0x15   :  { %215 = vmatpush.bf16.msra.mxu1 %v317_v5 }
  0x18   :  { %131 = vmatpush.bf16.msra.mxu0 %v308_v6 }
  0x19   :  { %216 = vmatpush.bf16.msra.mxu1 %v316_v7 }
  0x1c   :  { %132 = vmatpush.bf16.msra.mxu0 %v307_v8 }
  0x1d   :  { %217 = vmatpush.bf16.msra.mxu1 %v315_v13 }
  0x20   :  { %133 = vmatpush.bf16.msra.mxu0 %v306_v9 }
  0x21   :  { %218 = vmatpush.bf16.msra.mxu1 %v314_v14 }
  0x24   :  { %134 = vmatpush.bf16.msra.mxu0 %v305_v10 }
  0x25   :  { %219 = vmatpush.bf16.msra.mxu1 %v313_v15 }
  0x28   :  { %135 = vmatpush.bf16.msra.mxu0 %v304_v11 }
  0x29   :  { %220 = vmatpush.bf16.msra.mxu1 %v312_v16 }
  0x2b   :  { %136 = vmatmul.bf16.vlgmr.msra.gmra.mxu0 %v303_v12 }
  0xa8   :  { %v137_v17 = vpop.f32.mrf.mxu0 }
  0xa9   :  { %v138_v19 = vadd.f32 %v324_v18, %v137_v17 }
  0xab   :  { %v142_v22 = vmax.f32 %v138_v19, 0.0 }
  0xb0   :  { %v139_v20 = vpop.f32.mrf.mxu0 }
  0xb1   :  { %v140_v21 = vadd.f32 %v324_v18, %v139_v20 }
  0xb3   :  { %v143_v23 = vmax.f32 %v140_v21, 0.0 }
  0xb5   :  { %v144_v24 = vpack.c.bf16 %v143_v23, %v142_v22 }
  0xb7   :  { %221 = vmatmul.bf16.vlgmr.msra.gmra.mxu1 %v144_v24 }
 0x134   :  { %v222_v26 = vpop.f32.mrf.mxu1 }
 0x135   :  { %v223_v27 = vadd.f32 %v325_v25, %v222_v26 }
 0x137   :  { %227 = vst [vmem:[%s438_s5] sm:$0xff] %v223_v27 }
 0x13c   :  { %v224_v28 = vpop.f32.mrf.mxu1 }
 0x13d   :  { %v225_v29 = vadd.f32 %v325_v25, %v224_v28 }
 0x13f   :  { %228 = vst [vmem:[%s438_s5 + $0x8] sm:$0xff] %v225_v29 }
 0x140   :  { %233 = vsyncpa [#allocation3], 1 }
 0x141   :  { %234 = vsyncpa [#allocation5], 1 }

</bundles_post_ra>
